<compile_context>
chip_gen: v5e
topology: v5e:2x2
jax: 0.10.0
libtpu: 0.0.40
codegen_flags: <defaults>
</compile_context>

<pallas_src>
import jax
import jax.numpy as jnp
from jax.experimental import pallas as pl
from jax.experimental.pallas import tpu as pltpu


# ---------------------------------------------------------------------------
# Kernels
# ---------------------------------------------------------------------------
def _rowsum_broadcast_kernel(x_ref, o_ref):
    """out[i, :] = sum_j((x[i, j] + 2) * 3) for one (tile_b, D) block."""
    d = x_ref.shape[-1]
    # Cast fused into the reduce: no full f32 copy of the tile.
    s = jnp.sum(x_ref[...], axis=-1, keepdims=True, dtype=jnp.float32)
    s = s * 3.0 + 6.0 * float(d)
    o_ref[...] = jnp.broadcast_to(s, o_ref.shape).astype(o_ref.dtype)


def _make_dtiled_rowsum_kernel(d_total: int, tile_d: int):
    """D-tiled reduction: emits (tile_b, 1) row sums of (x+2)*3 for huge D."""

    def kernel(x_ref, o_ref, acc_ref):
        k = pl.program_id(1)

        @pl.when(k == 0)
        def _():
            acc_ref[...] = jnp.zeros_like(acc_ref)

        x = x_ref[...]
        # Mask out-of-range columns of a ragged trailing D block (they would
        # otherwise pollute the reduction).
        col = jax.lax.broadcasted_iota(jnp.int32, x.shape, dimension=x.ndim - 1)
        valid = (k * tile_d + col) < d_total
        xv = jnp.where(valid, x, jnp.zeros_like(x))
        acc_ref[...] += jnp.sum(xv, axis=-1, keepdims=True, dtype=jnp.float32)

        @pl.when(k == pl.num_programs(1) - 1)
        def _():
            o_ref[...] = (acc_ref[...] * 3.0 + 6.0 * float(d_total)).astype(o_ref.dtype)

    return kernel


# ---------------------------------------------------------------------------
# Tiling helpers
# ---------------------------------------------------------------------------
def _round_up(x: int, m: int) -> int:
    return (x + m - 1) // m * m


def _sublane_pack(dtype) -> int:
    # Rows per packed sublane group: 8 for 32-bit, 16 for 16-bit, 32 for 8-bit.
    itemsize = jnp.dtype(dtype).itemsize
    return 8 * max(1, 4 // itemsize)


def _vmem_capacity_bytes() -> int:
    try:
        return int(pltpu.get_tpu_info().vmem_capacity_bytes)
    except Exception:
        return 64 * 1024 * 1024  # assume the tightest generation (v7x)


def _budgets() -> tuple[int, int]:
    """(per-resident-buffer byte budget, vmem_limit_bytes), generation aware."""
    cap = _vmem_capacity_bytes()
    per_buffer = cap // 9          # ~7.1 MiB on v7x (64 MiB), ~14.2 MiB on v5e/v6e
    vmem_limit = int(cap * 0.72)   # ~46 MiB on v7x, ~92 MiB on v5e/v6e
    return per_buffer, vmem_limit


# ---------------------------------------------------------------------------
# Wrapper
# ---------------------------------------------------------------------------
def ptmodule_forward(
    x: jax.Array,
    *,
    tile_b: int | None = None,
    tile_d: int | None = None,
    force_d_tiled: bool = False,
) -> jax.Array:
    assert x.ndim == 2, "PtModule loop semantics implemented for 2-D (B, D) input"
    B, D = x.shape
    pack = _sublane_pack(x.dtype)
    itemsize = jnp.dtype(x.dtype).itemsize
    per_buffer_budget, vmem_limit_bytes = _budgets()

    row_bytes = D * itemsize
    single_block_fits = pack * row_bytes <= per_buffer_budget

    if single_block_fits and not force_d_tiled:
        # ---- main path: one full-D block per row tile, streamed over B ----
        if tile_b is None:
            tile_b = max(pack, (per_buffer_budget // row_bytes) // pack * pack)
        else:
            tile_b = _round_up(tile_b, pack)
        # Don't allocate a block bigger than the (sublane-rounded) batch.
        tile_b = min(tile_b, _round_up(B, pack))
        grid = (pl.cdiv(B, tile_b),)  # ragged trailing block masked by Pallas

        return pl.pallas_call(
            _rowsum_broadcast_kernel,
            out_shape=jax.ShapeDtypeStruct((B, D), x.dtype),
            grid_spec=pltpu.PrefetchScalarGridSpec(
                num_scalar_prefetch=0,
                grid=grid,
                in_specs=[pl.BlockSpec((tile_b, D), lambda i: (i, 0))],
                out_specs=pl.BlockSpec((tile_b, D), lambda i: (i, 0)),
            ),
            compiler_params=pltpu.CompilerParams(
                dimension_semantics=("parallel",),
                vmem_limit_bytes=vmem_limit_bytes,
            ),
        )(x)

    # ---- fallback for very large D: tile the reduction axis, emit (B, 1) ----
    if tile_b is None:
        tile_b = min(_round_up(B, pack), 512)
    else:
        tile_b = min(_round_up(tile_b, pack), _round_up(B, pack))
    if tile_d is None:
        tile_d = max(128, (per_buffer_budget // (tile_b * itemsize)) // 128 * 128)
    else:
        tile_d = _round_up(tile_d, 128)
    tile_d = min(tile_d, _round_up(D, 128))
    grid = (pl.cdiv(B, tile_b), pl.cdiv(D, tile_d))

    sums = pl.pallas_call(
        _make_dtiled_rowsum_kernel(D, tile_d),
        out_shape=jax.ShapeDtypeStruct((B, 1), x.dtype),
        grid_spec=pltpu.PrefetchScalarGridSpec(
            num_scalar_prefetch=0,
            grid=grid,
            in_specs=[pl.BlockSpec((tile_b, tile_d), lambda i, k: (i, k))],
            out_specs=pl.BlockSpec((tile_b, 1), lambda i, k: (i, 0)),
            scratch_shapes=[pltpu.VMEM((tile_b, 1), jnp.float32)],
        ),
        compiler_params=pltpu.CompilerParams(
            dimension_semantics=("parallel", "arbitrary"),
            vmem_limit_bytes=vmem_limit_bytes,
        ),
    )(x)
    # Broadcast back to (B, D) outside the kernel (the (B, D) write is then
    # XLA's to fuse or stream; total HBM traffic is unchanged at worst).
    return jnp.broadcast_to(sums, (B, D))


# ---------------------------------------------------------------------------
# Pure-JAX reference (matches the PyTorch module)
# ---------------------------------------------------------------------------
def ptmodule_reference(x: jax.Array) -> jax.Array:
    y = (x.astype(jnp.float32) + 2.0) * 3.0
    s = jnp.sum(y, axis=-1, keepdims=True)
    return jnp.broadcast_to(s, x.shape).astype(x.dtype)


# ---------------------------------------------------------------------------
# Main
# ---------------------------------------------------------------------------
if __name__ == "__main__":
    k1, k2, k3 = jax.random.split(jax.random.PRNGKey(0), 3)

    # 1) Ragged B (20 rows) with auto-sized tile — exercises the in-grid
    #    partial-block handling on the main full-D path.
    x1 = jax.random.normal(k1, (20, 128), dtype=jnp.float32)
    out1 = jax.block_until_ready(ptmodule_forward(x1))
    ref1 = ptmodule_reference(x1)
    assert out1.shape == ref1.shape
    assert jnp.allclose(out1, ref1, rtol=1e-5, atol=1e-2), "mismatch (test 1)"

    # 2) Explicit tile → multi-step grid on the main path.
    x2 = jax.random.normal(k2, (512, 256), dtype=jnp.float32)
    out2 = jax.block_until_ready(ptmodule_forward(x2, tile_b=128))
    ref2 = ptmodule_reference(x2)
    assert out2.shape == ref2.shape
    assert jnp.allclose(out2, ref2, rtol=1e-5, atol=1e-2), "mismatch (test 2)"

    # 3) Force the D-tiled fallback path (used for very large D in practice).
    x3 = jax.random.normal(k3, (16, 512), dtype=jnp.float32)
    out3 = jax.block_until_ready(ptmodule_forward(x3, force_d_tiled=True, tile_d=128))
    ref3 = ptmodule_reference(x3)
    assert out3.shape == ref3.shape
    assert jnp.allclose(out3, ref3, rtol=1e-5, atol=1e-2), "mismatch (test 3)"

    print("KERNEL_OK")
</pallas_src>

<mosaic_0001>
module attributes {stable_mosaic.version = 11 : i64} {
  func.func @_rowsum_broadcast_kernel(%arg0: i32, %arg1: memref<24x128xf32, #tpu.memory_space<vmem>>, %arg2: memref<24x128xf32, #tpu.memory_space<vmem>>) attributes {dimension_semantics = [#tpu.dimension_semantics<parallel>], iteration_bounds = array<i64: 1>, scalar_prefetch = 0 : i64, scratch_operands = 0 : i64, tpu.core_type = #tpu.core_type<tc>, window_params = [{transform_indices = @transform_0, window_bounds = array<i64: 24, 128>}, {transform_indices = @transform_1, window_bounds = array<i64: 24, 128>}]} {
    %c0 = arith.constant 0 : index
    %c0_0 = arith.constant 0 : index
    %0 = vector.load %arg1[%c0, %c0_0] : memref<24x128xf32, #tpu.memory_space<vmem>>, vector<24x128xf32>
    %cst = arith.constant dense<0.000000e+00> : vector<24xf32>
    %1 = vector.multi_reduction <add>, %0, %cst [1] : vector<24x128xf32> to vector<24xf32>
    %2 = vector.shape_cast %1 : vector<24xf32> to vector<24x1xf32>
    %cst_1 = arith.constant 3.000000e+00 : f32
    %3 = vector.broadcast %cst_1 : f32 to vector<24x1xf32>
    %4 = arith.mulf %2, %3 : vector<24x1xf32>
    %cst_2 = arith.constant 7.680000e+02 : f32
    %5 = vector.broadcast %cst_2 : f32 to vector<24x1xf32>
    %6 = arith.addf %4, %5 : vector<24x1xf32>
    %7 = vector.shape_cast %6 : vector<24x1xf32> to vector<24x1xf32>
    %8 = vector.broadcast %7 : vector<24x1xf32> to vector<24x128xf32>
    %c0_3 = arith.constant 0 : index
    %c0_4 = arith.constant 0 : index
    %9 = vector.load %arg2[%c0_3, %c0_4] : memref<24x128xf32, #tpu.memory_space<vmem>>, vector<24x128xf32>
    tpu.vector_store %arg2[%c0_3, %c0_4], %8 {strides = array<i32>} : memref<24x128xf32, #tpu.memory_space<vmem>>, vector<24x128xf32>,
    return
  }
  func.func @transform_0(%arg0: i32) -> (i32, i32) {
    %c0_i32 = arith.constant 0 : i32
    %c0_i32_0 = arith.constant 0 : i32
    return %arg0, %c0_i32 : i32, i32
  }
  func.func @transform_1(%arg0: i32) -> (i32, i32) {
    %c0_i32 = arith.constant 0 : i32
    %c0_i32_0 = arith.constant 0 : i32
    return %arg0, %c0_i32 : i32, i32
  }
}

</mosaic_0001>

<bundles_post_ra>
// kernel: tpu_custom_call.1
= control target key start
LH: loop header
LB: loop body
LE: loop exit
PB: predicated region body
PF: predicated region fallthrough
CT: control target
= control target key end

     0   :  { %6 = vsyncpa [#allocation3], 0  ;;  %s144_s0 = inlined_call_operand.hbm [shape: f32[20,128], index: 0, kind: input, shape index: {}]   ;;  %s145_s1 = inlined_call_operand.hbm [shape: f32[20,128], index: 1, kind: output, shape index: {}]  }
   0x1   :  { %7 = vsyncpa [#allocation4], 0  ;;  %s12_s8 = sshll.u32 %s144_s0, 4  ;;  %s118_s9 = smov [#allocation2]   ;;  %s13_s8 = int_to_ptr.hbm [resolvable:$true] %s12_s8 }
   0x2   :  { %s14_s10 = sshll.u32 %s118_s9, 4  ;;  %s119_s11 = smov 128   ;;  %s15_s10 = int_to_ptr.vmem [resolvable:$true] %s14_s10 }
   0x3   :  { %s120_s12 = smov 8  }
   0x4   :  { %20 = dma.hbm_to_vmem [thread:$0]  %s13_s8, 384, %s15_s10, [#allocation3], %s119_s11, %s119_s11, %s120_s12  }
   0x5   :  { %114 = dma.done.wait [#allocation3], 384  }
   0x6   :  { %115 = vsyncadd [#allocation3], 4294966912  ;;  %v25_v0 = vld [vmem:[#allocation2] sm:$0xff]  ;;  %v27_v1 = vld [vmem:[#allocation2 + $0x10] sm:$0xff]  ;;  %s121_s0 = smov [#allocation5]   ;;  %s49_s16 = sshll.u32 %s145_s1, 4  ;;  %s50_s16 = int_to_ptr.hbm [resolvable:$true] %s49_s16 }
   0x7   :  { %28 = vadd.xlane.f32.xlu0 %v25_v0  ;;  %32 = vadd.xlane.f32.xlu1 %v27_v1  ;;  %v26_v2 = vld [vmem:[#allocation2 + $0x8] sm:$0xff]  ;;  %s47_s13 = sshll.u32 %s121_s0, 4  ;;  %s48_s13 = int_to_ptr.vmem [resolvable:$true] %s47_s13 }
   0xf   :  { %30 = vadd.xlane.f32.xlu0 %v26_v2 }
  0x7a   :  { %v29_v3 = vpop.xlane.xlu0 %28  ;;  %v33_v4 = vpop.xlane.xlu1 %32 }
  0x7b   :  { %v34_v5 = vmul.f32 3.0, %v29_v3  ;;  %v36_v6 = vmul.f32 3.0, %v33_v4 }
  0x7d   :  { %v37_v7 = vadd.f32 768.0, %v34_v5  ;;  %v39_v8 = vadd.f32 768.0, %v36_v6 }
  0x7f   :  { %40 = vst [vmem:[#allocation5] sm:$0xff] %v37_v7 }
  0x80   :  { %42 = vst [vmem:[#allocation5 + $0x10] sm:$0xff] %v39_v8 }
  0x82   :  { %v31_v9 = vpop.xlane.xlu0 %30 }
  0x83   :  { %v35_v10 = vmul.f32 3.0, %v31_v9 }
  0x85   :  { %v38_v11 = vadd.f32 768.0, %v35_v10 }
  0x87   :  { %41 = vst [vmem:[#allocation5 + $0x8] sm:$0xff] %v38_v11 }
  0x88   :  { %55 = dma.vmem_to_hbm [thread:$0]  %s48_s13, 384, %s50_s16, [#allocation4], %s119_s11, %s119_s11, %s120_s12  }
  0x89   :  { %116 = dma.done.wait [#allocation4], 384  }
  0x8a   :  { %117 = vsyncadd [#allocation4], 4294966912 }
  0x8b   :  { %60 = vsyncpa [#allocation3], 1 }
  0x8c   :  { %61 = vsyncpa [#allocation4], 1 }

</bundles_post_ra>
